<compile_context>
chip_gen: v6e
topology: v6e:2x2x1
jax: 0.10.0
libtpu: 0.0.40
codegen_flags: <defaults>
</compile_context>

<pallas_src>
import jax
import jax.numpy as jnp
from jax.experimental import pallas as pl
from jax.experimental.pallas import tpu as pltpu

EPS = 1e-5


# ---------------------------------------------------------------------------
# Pass 1: conv tile + per-tile partial statistics.
# ---------------------------------------------------------------------------
def _conv_stats_kernel(w_ref, patches_ref, conv_ref, sum_ref, sumsq_ref):
    # w:       (Cout, K)
    # patches: (K, TILE_P)          lane-dense positions (padded cols are 0)
    # conv:    (Cout, TILE_P)       unnormalized conv output (written to HBM)
    # sum/sumsq: (1, Cout, 1)       per-tile partial statistics
    conv = jnp.dot(w_ref[...], patches_ref[...],
                   preferred_element_type=jnp.float32)
    conv_ref[...] = conv
    # Padded columns are exact zeros (no conv bias in-kernel), so no masking.
    sum_ref[0] = jnp.sum(conv, axis=1, keepdims=True)
    sumsq_ref[0] = jnp.sum(conv * conv, axis=1, keepdims=True)


# ---------------------------------------------------------------------------
# Pass 2: pure load-mul-add-store normalization with pre-folded scale/shift.
# ---------------------------------------------------------------------------
def _normalize_kernel(scale_ref, shift_ref, conv_ref, out_ref):
    out_ref[...] = conv_ref[...] * scale_ref[...] + shift_ref[...]


def im2col_t(x, kh, kw):
    """x: (N, Cin, H, W) -> (Cin*KH*KW, N*OH*OW), features ordered (ci, kh, kw)."""
    n, cin, h, w = x.shape
    oh, ow = h - kh + 1, w - kw + 1
    cols = jnp.stack(
        [x[:, :, i:i + oh, j:j + ow] for i in range(kh) for j in range(kw)],
        axis=2,
    )  # (N, Cin, KH*KW, OH, OW)
    cols = jnp.transpose(cols, (1, 2, 0, 3, 4))  # (Cin, KH*KW, N, OH, OW)
    return cols.reshape(cin * kh * kw, n * oh * ow), (n, oh, ow)


def model_forward(x, conv_w, conv_b, gamma, beta):
    # x: (N, 3, H, W); conv_w: (Cout=3, Cin=3, 4, 4); conv_b/gamma/beta: (3,)
    del conv_b  # cancels exactly under training-mode BatchNorm (mean subtraction)
    cout, cin, kh, kw = conv_w.shape

    patches_t, (n, oh, ow) = im2col_t(x.astype(jnp.float32), kh, kw)  # (K, P)
    k_dim, p = patches_t.shape

    # Lane-dense position tiling; large tiles for a bandwidth-bound kernel.
    tile_p = min(8192, ((p + 127) // 128) * 128)
    p_pad = ((p + tile_p - 1) // tile_p) * tile_p
    num_tiles = p_pad // tile_p
    patches_t = jnp.pad(patches_t, ((0, 0), (0, p_pad - p)))

    w_t = conv_w.reshape(cout, cin * kh * kw).astype(jnp.float32)  # (Cout, K)

    # -------- Pass 1: conv + per-tile stats (tile axis parallel) --------
    conv_t, sums, sumsqs = pl.pallas_call(
        _conv_stats_kernel,
        out_shape=(
            jax.ShapeDtypeStruct((cout, p_pad), jnp.float32),
            jax.ShapeDtypeStruct((num_tiles, cout, 1), jnp.float32),
            jax.ShapeDtypeStruct((num_tiles, cout, 1), jnp.float32),
        ),
        grid_spec=pltpu.PrefetchScalarGridSpec(
            num_scalar_prefetch=0,
            grid=(num_tiles,),
            in_specs=[
                pl.BlockSpec((cout, k_dim), lambda t: (0, 0)),    # weights
                pl.BlockSpec((k_dim, tile_p), lambda t: (0, t)),  # patches
            ],
            out_specs=[
                pl.BlockSpec((cout, tile_p), lambda t: (0, t)),   # conv out
                pl.BlockSpec((1, cout, 1), lambda t: (t, 0, 0)),  # per-tile sum
                pl.BlockSpec((1, cout, 1), lambda t: (t, 0, 0)),  # per-tile sumsq
            ],
        ),
        compiler_params=pltpu.CompilerParams(
            dimension_semantics=("parallel",)),
        cost_estimate=pl.CostEstimate(
            flops=2 * cout * k_dim * p_pad + 4 * cout * p_pad,
            transcendentals=0,
            bytes_accessed=4 * (k_dim * p_pad + cout * p_pad
                                + cout * k_dim + 2 * num_tiles * cout)),
    )(w_t, patches_t)

    # -------- Tiny cross-tile reduction + BN folding (3 channels, plain JAX) --------
    inv_n = 1.0 / float(p)
    mean = jnp.sum(sums, axis=0) * inv_n                    # (Cout, 1)
    var = jnp.sum(sumsqs, axis=0) * inv_n - mean * mean     # biased variance
    scale = gamma.reshape(cout, 1).astype(jnp.float32) * jax.lax.rsqrt(var + EPS)
    shift = beta.reshape(cout, 1).astype(jnp.float32) - mean * scale

    # -------- Pass 2: normalize the 3-row conv output (no patch re-read) --------
    out_t = pl.pallas_call(
        _normalize_kernel,
        out_shape=jax.ShapeDtypeStruct((cout, p_pad), jnp.float32),
        grid_spec=pltpu.PrefetchScalarGridSpec(
            num_scalar_prefetch=0,
            grid=(num_tiles,),
            in_specs=[
                pl.BlockSpec((cout, 1), lambda t: (0, 0)),        # folded scale
                pl.BlockSpec((cout, 1), lambda t: (0, 0)),        # folded shift
                pl.BlockSpec((cout, tile_p), lambda t: (0, t)),   # conv
            ],
            out_specs=pl.BlockSpec((cout, tile_p), lambda t: (0, t)),
        ),
        compiler_params=pltpu.CompilerParams(
            dimension_semantics=("parallel",)),
        cost_estimate=pl.CostEstimate(
            flops=2 * cout * p_pad,
            transcendentals=0,
            bytes_accessed=4 * 2 * cout * p_pad),
    )(scale, shift, conv_t)

    out = out_t[:, :p].reshape(cout, n, oh, ow)   # drop lane padding
    return jnp.transpose(out, (1, 0, 2, 3))       # back to NCHW


if __name__ == "__main__":
    key = jax.random.PRNGKey(0)
    k_x, k_w, k_b = jax.random.split(key, 3)

    # Small shapes consistent with the module: Conv2d(3, 3, 4) on 6x6 spatial.
    N, Cin, H, W = 2, 3, 6, 6
    Cout, KH, KW = 3, 4, 4

    x1 = jax.random.uniform(k_x, (N, Cin, H, W), dtype=jnp.float32)

    # Deterministic parameter init (PyTorch-style uniform bound for conv).
    fan_in = Cin * KH * KW
    bound = 1.0 / (fan_in ** 0.5)
    conv_w = jax.random.uniform(k_w, (Cout, Cin, KH, KW), minval=-bound,
                                maxval=bound, dtype=jnp.float32)
    conv_b = jax.random.uniform(k_b, (Cout,), minval=-bound, maxval=bound,
                                dtype=jnp.float32)
    gamma = jnp.ones((Cout,), jnp.float32)   # BatchNorm2d weight
    beta = jnp.zeros((Cout,), jnp.float32)   # BatchNorm2d bias

    out = model_forward(x1, conv_w, conv_b, gamma, beta)
    jax.block_until_ready(out)

    # Sanity check against pure-JAX reference (bias included — it must cancel).
    ref_conv = jax.lax.conv_general_dilated(
        x1, conv_w, window_strides=(1, 1), padding="VALID",
        dimension_numbers=("NCHW", "OIHW", "NCHW"),
    ) + conv_b.reshape(1, Cout, 1, 1)
    m = jnp.mean(ref_conv, axis=(0, 2, 3), keepdims=True)
    v = jnp.mean((ref_conv - m) ** 2, axis=(0, 2, 3), keepdims=True)
    ref = (ref_conv - m) * jax.lax.rsqrt(v + EPS) * gamma.reshape(1, Cout, 1, 1) \
        + beta.reshape(1, Cout, 1, 1)

    assert out.shape == (N, Cout, H - KH + 1, W - KW + 1)
    assert jnp.max(jnp.abs(out - ref)) < 1e-4

    print("KERNEL_OK")
</pallas_src>

<mosaic_0001>
module attributes {stable_mosaic.version = 11 : i64} {
  func.func @_conv_stats_kernel(%arg0: i32, %arg1: memref<3x48xf32, #tpu.memory_space<vmem>>, %arg2: memref<48x128xf32, #tpu.memory_space<vmem>>, %arg3: memref<3x128xf32, #tpu.memory_space<vmem>>, %arg4: memref<1x3x1xf32, #tpu.memory_space<vmem>>, %arg5: memref<1x3x1xf32, #tpu.memory_space<vmem>>) attributes {dimension_semantics = [#tpu.dimension_semantics<parallel>], iteration_bounds = array<i64: 1>, scalar_prefetch = 0 : i64, scratch_operands = 0 : i64, tpu.core_type = #tpu.core_type<tc>, window_params = [{pipeline_mode = #tpu.pipeline_mode<synchronous>, transform_indices = @transform_0, window_bounds = array<i64: 3, 48>}, {transform_indices = @transform_1, window_bounds = array<i64: 48, 128>}, {transform_indices = @transform_2, window_bounds = array<i64: 3, 128>}, {transform_indices = @transform_3, window_bounds = array<i64: 1, 3, 1>}, {transform_indices = @transform_4, window_bounds = array<i64: 1, 3, 1>}]} {
    %c0 = arith.constant 0 : index
    %c0_0 = arith.constant 0 : index
    %0 = vector.load %arg1[%c0, %c0_0] : memref<3x48xf32, #tpu.memory_space<vmem>>, vector<3x48xf32>
    %c0_1 = arith.constant 0 : index
    %c0_2 = arith.constant 0 : index
    %1 = vector.load %arg2[%c0_1, %c0_2] : memref<48x128xf32, #tpu.memory_space<vmem>>, vector<48x128xf32>
    %cst = arith.constant dense<0.000000e+00> : vector<3x128xf32>
    %2 = tpu.matmul %0, %1, %cst {dimension_numbers = #tpu.dot_dimension_numbers<[1], [0], [0], [1], [0, 0, 1, 1], [], []>} : vector<3x48xf32>, vector<48x128xf32>, vector<3x128xf32> -> vector<3x128xf32>
    %c0_3 = arith.constant 0 : index
    %c0_4 = arith.constant 0 : index
    %3 = vector.load %arg3[%c0_3, %c0_4] : memref<3x128xf32, #tpu.memory_space<vmem>>, vector<3x128xf32>
    tpu.vector_store %arg3[%c0_3, %c0_4], %2 {strides = array<i32>} : memref<3x128xf32, #tpu.memory_space<vmem>>, vector<3x128xf32>,
    %cst_5 = arith.constant dense<0.000000e+00> : vector<3xf32>
    %4 = vector.multi_reduction <add>, %2, %cst_5 [1] : vector<3x128xf32> to vector<3xf32>
    %5 = vector.shape_cast %4 : vector<3xf32> to vector<3x1xf32>
    %c0_6 = arith.constant 0 : index
    %c0_7 = arith.constant 0 : index
    %c0_8 = arith.constant 0 : index
    %6 = vector.load %arg4[%c0_6, %c0_7, %c0_8] : memref<1x3x1xf32, #tpu.memory_space<vmem>>, vector<1x3x1xf32>
    %7 = vector.shape_cast %6 : vector<1x3x1xf32> to vector<3x1xf32>
    %8 = vector.shape_cast %5 : vector<3x1xf32> to vector<1x3x1xf32>
    tpu.vector_store %arg4[%c0_6, %c0_7, %c0_8], %8 {strides = array<i32>} : memref<1x3x1xf32, #tpu.memory_space<vmem>>, vector<1x3x1xf32>,
    %9 = arith.mulf %2, %2 : vector<3x128xf32>
    %cst_9 = arith.constant dense<0.000000e+00> : vector<3xf32>
    %10 = vector.multi_reduction <add>, %9, %cst_9 [1] : vector<3x128xf32> to vector<3xf32>
    %11 = vector.shape_cast %10 : vector<3xf32> to vector<3x1xf32>
    %c0_10 = arith.constant 0 : index
    %c0_11 = arith.constant 0 : index
    %c0_12 = arith.constant 0 : index
    %12 = vector.load %arg5[%c0_10, %c0_11, %c0_12] : memref<1x3x1xf32, #tpu.memory_space<vmem>>, vector<1x3x1xf32>
    %13 = vector.shape_cast %12 : vector<1x3x1xf32> to vector<3x1xf32>
    %14 = vector.shape_cast %11 : vector<3x1xf32> to vector<1x3x1xf32>
    tpu.vector_store %arg5[%c0_10, %c0_11, %c0_12], %14 {strides = array<i32>} : memref<1x3x1xf32, #tpu.memory_space<vmem>>, vector<1x3x1xf32>,
    return
  }
  func.func @transform_0(%arg0: i32) -> (i32, i32) {
    %c0_i32 = arith.constant 0 : i32
    %c0_i32_0 = arith.constant 0 : i32
    %c0_i32_1 = arith.constant 0 : i32
    return %c0_i32, %c0_i32_0 : i32, i32
  }
  func.func @transform_1(%arg0: i32) -> (i32, i32) {
    %c0_i32 = arith.constant 0 : i32
    %c0_i32_0 = arith.constant 0 : i32
    return %c0_i32, %arg0 : i32, i32
  }
  func.func @transform_2(%arg0: i32) -> (i32, i32) {
    %c0_i32 = arith.constant 0 : i32
    %c0_i32_0 = arith.constant 0 : i32
    return %c0_i32, %arg0 : i32, i32
  }
  func.func @transform_3(%arg0: i32) -> (i32, i32, i32) {
    %c0_i32 = arith.constant 0 : i32
    %c0_i32_0 = arith.constant 0 : i32
    %c0_i32_1 = arith.constant 0 : i32
    return %arg0, %c0_i32, %c0_i32_0 : i32, i32, i32
  }
  func.func @transform_4(%arg0: i32) -> (i32, i32, i32) {
    %c0_i32 = arith.constant 0 : i32
    %c0_i32_0 = arith.constant 0 : i32
    %c0_i32_1 = arith.constant 0 : i32
    return %arg0, %c0_i32, %c0_i32_0 : i32, i32, i32
  }
}

</mosaic_0001>

<bundles_post_ra>
// kernel: tpu_custom_call.1
= control target key start
LH: loop header
LB: loop body
LE: loop exit
PB: predicated region body
PF: predicated region fallthrough
CT: control target
= control target key end

     0   :  { %10 = vsyncpa [#allocation3], 0  ;;  %s301_s0 = inlined_call_operand.hbm [shape: f32[3,48], index: 0, kind: input, shape index: {}]   ;;  %s302_s1 = inlined_call_operand.hbm [shape: f32[48,128], index: 1, kind: input, shape index: {}]   ;;  %s303_s2 = inlined_call_operand.hbm [shape: f32[3,128], index: 2, kind: output, shape index: {0}]   ;;  %s304_s3 = inlined_call_operand.vmem [shape: f32[1,3,1], index: 3, kind: output, shape index: {1}]   ;;  %s305_s4 = inlined_call_operand.vmem [shape: f32[1,3,1], index: 4, kind: output, shape index: {2}]  }
   0x1   :  { %11 = vsyncpa [#allocation6], 0 }
   0x2   :  { %12 = vsyncpa [#allocation4], 0  ;;  %s254_s15 = smov [#allocation2]   ;;  %s255_s17 = smov [#allocation5]  }
   0x3   :  { %s19_s16 = sshll.u32 %s254_s15, 4  ;;  %s28_s18 = sshll.u32 %s255_s17, 4  ;;  %s20_s16 = int_to_ptr.vmem [resolvable:$true] %s19_s16  ;;  %s29_s18 = int_to_ptr.vmem [resolvable:$true] %s28_s18 }
   0x4   :  { %s196_s19 = scalar_lea.vmem %s20_s16, 64  ;;  %p201_p1 = scmp.lt.s32.totalorder %s20_s16, %s20_s16 }
   0x5   :  { %p197_p0 = scmp.ne.s32.totalorder %s20_s16, %s196_s19  ;;  %p202_p2 = scmp.lt.s32.totalorder %s196_s19, %s196_s19 }
   0x7   :  { %p203_p3 = por %p202_p2, %p201_p1 }
   0x9   :  { %p204_p4 = pnand %p203_p3, %p197_p0 }
   0xb   :  { %207 = shalt.err (!%p204_p4)
}
   0xc   :  { %22 = dma.hbm_to_vmem [thread:$0]  %s301_s0, 64, %s20_s16, [#allocation3]  }
   0xd   :  { %s216_s22 = scalar_lea.vmem %s29_s18, 768  ;;  %p221_p6 = scmp.lt.s32.totalorder %s29_s18, %s29_s18 }
   0xe   :  { %p217_p5 = scmp.ne.s32.totalorder %s29_s18, %s216_s22  ;;  %p222_p7 = scmp.lt.s32.totalorder %s216_s22, %s216_s22 }
  0x10   :  { %p223_p8 = por %p222_p7, %p221_p6 }
  0x12   :  { %p224_p9 = pnand %p223_p8, %p217_p5 }
  0x14   :  { %227 = shalt.err (!%p224_p9)
}
  0x15   :  { %s256_s23 = smov 128   ;;  %s257_s24 = smov 8  }
  0x16   :  { %34 = dma.hbm_to_vmem [thread:$0]  %s302_s1, 768, %s29_s18, [#allocation6], %s256_s23, %s256_s23, %s257_s24  }
  0x17   :  { %248 = dma.done.wait [#allocation3], 64  }
  0x18   :  { %249 = vsyncadd [#allocation3], 4294967232 }
  0x19   :  { %250 = dma.done.wait [#allocation6], 768  }
  0x1a   :  { %251 = vsyncadd [#allocation6], 4294966528  ;;  %v258_v0 = vmov 0.0   ;;  %vm259_vm0 = vmmov 0   ;;  %v47_v1 = vld [vmem:[#allocation5 + $0x28] sm:$0xff]  ;;  %v46_v2 = vld [vmem:[#allocation5 + $0x20] sm:$0xff] }
  0x1b   :  { %166 = vmatprep.subr.mxu0 %v258_v0  ;;  %178 = vmatprep.mubr.msk.f32.mxu0 %vm259_vm0, %v258_v0  ;;  %v45_v3 = vld [vmem:[#allocation5 + $0x18] sm:$0xff]  ;;  %v44_v4 = vld [vmem:[#allocation5 + $0x10] sm:$0xff]  ;;  %v43_v5 = vld [vmem:[#allocation5 + $0x8] sm:$0xff]  ;;  %vm48_vm1 = vcmask 392192   ;;  %vm123_vm2 = vcmask 1042432   ;;  %s260_s0 = smov [#allocation7]  }
  0x1c   :  { %167 = vmatpush3.msra.mxu0 %v47_v1  ;;  %v42_v6 = vld [vmem:[#allocation5] sm:$0xff]  ;;  %v41_v7 = vld [vmem:[#allocation2] sm:$0x7]  ;;  %s140_s1 = sshll.u32 %s260_s0, 4  ;;  %s141_s1 = int_to_ptr.vmem [resolvable:$true] %s140_s1 }
  0x1d   :  { %168 = vmatprep.subr.mxu0 %v258_v0  ;;  %s228_s27 = scalar_lea.vmem %s141_s1, 64  ;;  %p233_p11 = scmp.lt.s32.totalorder %s141_s1, %s141_s1 }
  0x1e   :  { %169 = vmatpush3.msra.mxu0 %v46_v2  ;;  %p229_p10 = scmp.ne.s32.totalorder %s141_s1, %s228_s27  ;;  %p234_p12 = scmp.lt.s32.totalorder %s228_s27, %s228_s27 }
  0x1f   :  { %170 = vmatprep.subr.mxu0 %v258_v0 }
  0x20   :  { %171 = vmatpush3.msra.mxu0 %v45_v3  ;;  %p235_p13 = por %p234_p12, %p233_p11 }
  0x21   :  { %172 = vmatprep.subr.mxu0 %v258_v0 }
  0x22   :  { %173 = vmatpush3.msra.mxu0 %v44_v4  ;;  %p236_p0 = pnand %p235_p13, %p229_p10 }
  0x23   :  { %174 = vmatprep.subr.mxu0 %v258_v0 }
  0x24   :  { %175 = vmatpush3.msra.mxu0 %v43_v5 }
  0x25   :  { %176 = vmatprep.subr.mxu0 %v258_v0 }
  0x26   :  { %177 = vmatpush3.msra.mxu0 %v42_v6 }
  0x27   :  { %179 = vmatmul.mubr.msk.f32.vlgmr.msra.gmra.mxu0 %vm48_vm1, %v41_v7 }
  0xe7   :  { %v118_v8 = vpop.f32.mrf.mxu0 }
  0xe8   :  { %122 = vst [vmem:[#allocation7] sm:$0x7] %v118_v8  ;;  %v124_v9 = vsel %vm123_vm2, %v118_v8, 0.0  ;;  %v129_v10 = vmul.f32 %v118_v8, %v118_v8 }
  0xe9   :  { %125 = vadd.xlane.f32.xlu0 %v124_v9  ;;  %v180_v11 = vpop.f32.mrf.mxu0 }
  0xea   :  { %v130_v12 = vsel %vm123_vm2, %v129_v10, 0.0 }
  0xed   :  { %131 = vadd.xlane.f32.xlu0 %v130_v12 }
  0xee   :  { %239 = shalt.err (!%p236_p0)
}
  0xef   :  { %143 = dma.vmem_to_hbm [thread:$0]  %s141_s1, 64, %s303_s2, [#allocation4]   ;;  %vm127_vm3 = vcmask 2048  }
 0x172   :  { %v126_v13 = vpop.xlane.xlu0 %125 }
 0x173   :  { %128 = vst.msk [vmem:[%s304_s3] sm:$0x7] %vm127_vm3, %v126_v13 }
 0x176   :  { %v132_v14 = vpop.xlane.xlu0 %131 }
 0x177   :  { %133 = vst.msk [vmem:[%s305_s4] sm:$0x7] %vm127_vm3, %v132_v14 }
 0x178   :  { %252 = dma.done.wait [#allocation4], 64  }
 0x179   :  { %253 = vsyncadd [#allocation4], 4294967232 }
 0x17a   :  { %155 = vsyncpa [#allocation3], 1 }
 0x17b   :  { %156 = vsyncpa [#allocation6], 1 }
 0x17c   :  { %157 = vsyncpa [#allocation4], 1 }

</bundles_post_ra>
